<compile_context>
chip_gen: v6e
topology: v6e:2x2x1
jax: 0.10.0
libtpu: 0.0.40
codegen_flags: <defaults>
</compile_context>

<pallas_src>
import functools
import math

import jax
import jax.numpy as jnp
import numpy as np
from jax.experimental import pallas as pl
from jax.experimental.pallas import tpu as pltpu


def _self_attention_kernel(x_ref, wqkv_ref, bqkv_ref, cos_ref, sin_ref, o_ref,
                           *, compute_dtype):
    bt, s, d = x_ref.shape                       # static block shape
    h = cos_ref.shape[-1]                        # D // 2

    # --- Fused QKV projection: one fat (Bt*S, D) @ (D, 3D) matmul
    #     (f32 accumulate), single fused bias add.
    # Collapsing leading dims is a layout no-op (S is a multiple of 8).
    x2 = x_ref[...].reshape(bt * s, d).astype(compute_dtype)
    qkv = jnp.dot(x2, wqkv_ref[...],
                  preferred_element_type=jnp.float32) + bqkv_ref[...]

    # Static lane slices at D boundaries (aligned when D % 128 == 0).
    q3 = qkv[:, 0 * d:1 * d].reshape(bt, s, d)
    k3 = qkv[:, 1 * d:2 * d].reshape(bt, s, d)
    v3 = qkv[:, 2 * d:3 * d].reshape(bt, s, d)

    # --- RoPE in de-interleaved (real | imag) layout; all math in f32 (VPU).
    cos = cos_ref[...][None]                     # (1, S, h) broadcast over batch
    sin = sin_ref[...][None]
    qr, qi = q3[..., :h], q3[..., h:]
    kr, ki = k3[..., :h], k3[..., h:]
    # 1/sqrt(D) is already folded into wq/bq, so q_rot is pre-scaled.
    q_rot = jnp.concatenate([qr * cos - qi * sin, qr * sin + qi * cos], axis=-1)
    k_rot = jnp.concatenate([kr * cos - ki * sin, kr * sin + ki * cos], axis=-1)

    # --- Scores: single K=D contraction per batch, contracting dim 2 with dim 2
    # (no explicit transpose).  The feature permutation cancels here.
    scores = jnp.einsum("bqd,bkd->bqk",
                        q_rot.astype(compute_dtype), k_rot.astype(compute_dtype),
                        preferred_element_type=jnp.float32)

    # --- Softmax over keys (f32); divide replaced by EUP reciprocal + multiply.
    scores = scores - jnp.max(scores, axis=-1, keepdims=True)
    e = jnp.exp(scores)
    inv = pl.reciprocal(jnp.sum(e, axis=-1, keepdims=True), approx=False)
    p = e * inv

    # --- Weighted sum of values.
    out = jnp.einsum("bqk,bkd->bqd",
                     p.astype(compute_dtype), v3.astype(compute_dtype),
                     preferred_element_type=jnp.float32)
    o_ref[...] = out.astype(o_ref.dtype)


def prepare_params(wq, bq, wk, bk, wv, bv, max_seq_len, *, theta=10000.0,
                   compute_dtype=jnp.float32):
    """One-time parameter preparation (hoisted out of the per-call path).

    wq/wk/wv: (D, D) PyTorch convention (out, in).  bq/bk/bv: (D,).
    Returns a fused, transposed + de-interleaved QKV weight (with 1/sqrt(D)
    folded into the Q columns) plus the RoPE cos/sin tables for max_seq_len
    positions.
    """
    D = wq.shape[0]
    h = D // 2
    scale = 1.0 / math.sqrt(D)

    # De-interleave Q/K output features: even indices first, odd second.
    perm = jnp.concatenate([jnp.arange(0, D, 2), jnp.arange(1, D, 2)])
    wq_t = wq.T[:, perm] * scale          # 1/sqrt(D) folded into Q projection
    wk_t = wk.T[:, perm]
    wv_t = wv.T
    wqkv = jnp.concatenate([wq_t, wk_t, wv_t], axis=1).astype(compute_dtype)
    bqkv = jnp.concatenate([bq[perm] * scale, bk[perm], bv])[None, :]
    bqkv = bqkv.astype(jnp.float32)       # bias added in f32 after MXU

    # precompute_freqs_cis (cos/sin form).
    freqs = 1.0 / theta ** (jnp.arange(0, h, dtype=jnp.float32) * 2.0 / D)
    ang = jnp.outer(jnp.arange(max_seq_len, dtype=jnp.float32), freqs)  # (L, h)
    return dict(wqkv=wqkv, bqkv=bqkv,
                cos=jnp.cos(ang), sin=jnp.sin(ang),
                compute_dtype=compute_dtype)


def self_attention_pallas(x, params, *, batch_tile=None):
    """x: (B, S, D) f32; params from prepare_params (S must equal max_seq_len)."""
    B, S, D = x.shape
    h = D // 2
    cos, sin = params["cos"], params["sin"]
    assert cos.shape == (S, h), "kernel assumes S == max_seq_len (offset 0)"
    compute_dtype = params["compute_dtype"]

    # Batch tile: fatten the MXU M dimension (target ~128 rows per step) while
    # dividing B exactly.  On v7x (2 TCs) pass batch_tile=B//2 to occupy both
    # cores; on v5e/v6e (1 TC) fewer, fatter steps win.
    if batch_tile is None:
        batch_tile = max(1, min(B, pl.cdiv(128, S)))
    batch_tile = min(batch_tile, B)
    if S % 8 != 0:                       # keep the leading-dim collapse a no-op
        batch_tile = 1
    while B % batch_tile:
        batch_tile -= 1
    bt = batch_tile
    grid = (B // bt,)

    kernel = functools.partial(_self_attention_kernel,
                               compute_dtype=compute_dtype)

    # Advisory cost estimate for XLA's scheduler.
    wbytes = int(jnp.dtype(compute_dtype).itemsize)
    flops = (2 * B * S * D * (3 * D)          # fused QKV projection
             + 2 * (2 * B * S * S * D)        # scores + output matmuls
             + 12 * B * S * D)                # RoPE VPU work (approx)
    transcendentals = B * S * S
    bytes_accessed = (2 * B * S * D * 4 + 3 * D * D * wbytes
                      + 3 * D * 4 + 2 * S * h * 4)

    grid_spec = pltpu.PrefetchScalarGridSpec(
        num_scalar_prefetch=0,
        grid=grid,
        in_specs=[
            pl.BlockSpec((bt, S, D), lambda i: (i, 0, 0)),     # x
            pl.BlockSpec((D, 3 * D), lambda i: (0, 0)),        # wqkv (fused)
            pl.BlockSpec((1, 3 * D), lambda i: (0, 0)),        # bqkv (fused)
            pl.BlockSpec((S, h), lambda i: (0, 0)),            # cos
            pl.BlockSpec((S, h), lambda i: (0, 0)),            # sin
        ],
        out_specs=pl.BlockSpec((bt, S, D), lambda i: (i, 0, 0)),
    )

    # TODO(synk): for S >~ 1-2K add a KV-tile grid axis with online softmax
    # (flash-style) so the (S,S) score block stays within v7x's 64 MiB VMEM.
    return pl.pallas_call(
        kernel,
        out_shape=jax.ShapeDtypeStruct((B, S, D), jnp.float32),
        grid_spec=grid_spec,
        compiler_params=pltpu.CompilerParams(dimension_semantics=("parallel",)),
        cost_estimate=pl.CostEstimate(flops=int(flops),
                                      transcendentals=int(transcendentals),
                                      bytes_accessed=int(bytes_accessed)),
    )(x, params["wqkv"], params["bqkv"], cos, sin)


def self_attention_reference(x, wq, bq, wk, bk, wv, bv, *, theta=10000.0):
    """Pure-JAX replica of the PyTorch forward (interleaved complex RoPE)."""
    B, S, D = x.shape
    h = D // 2
    xq = x @ wq.T + bq
    xk = x @ wk.T + bk
    xv = x @ wv.T + bv
    freqs = 1.0 / theta ** (jnp.arange(0, h, dtype=jnp.float32) * 2.0 / D)
    ang = jnp.outer(jnp.arange(S, dtype=jnp.float32), freqs)   # (S, h)
    cos, sin = jnp.cos(ang), jnp.sin(ang)

    def rope(v):
        vr = v.reshape(B, S, h, 2)
        re = vr[..., 0] * cos - vr[..., 1] * sin
        im = vr[..., 0] * sin + vr[..., 1] * cos
        return jnp.stack([re, im], axis=-1).reshape(B, S, D)

    xq, xk = rope(xq), rope(xk)
    scores = jnp.einsum("bqd,bkd->bqk", xq, xk) / math.sqrt(D)
    scores = jax.nn.softmax(scores, axis=-1)
    return jnp.einsum("bqk,bkd->bqd", scores, xv)


if __name__ == "__main__":
    B, S, D = 2, 16, 32          # batch, seq (= max_seq_len), hidden dim
    key = jax.random.PRNGKey(0)
    kx, kwq, kbq, kwk, kbk, kwv, kbv = jax.random.split(key, 7)

    x = jax.random.normal(kx, (B, S, D), dtype=jnp.float32)
    bound = 1.0 / math.sqrt(D)   # nn.Linear default init range
    wq = jax.random.uniform(kwq, (D, D), jnp.float32, -bound, bound)
    bq = jax.random.uniform(kbq, (D,), jnp.float32, -bound, bound)
    wk = jax.random.uniform(kwk, (D, D), jnp.float32, -bound, bound)
    bk = jax.random.uniform(kbk, (D,), jnp.float32, -bound, bound)
    wv = jax.random.uniform(kwv, (D, D), jnp.float32, -bound, bound)
    bv = jax.random.uniform(kbv, (D,), jnp.float32, -bound, bound)

    # One-time parameter preparation (use compute_dtype=jnp.bfloat16 on v6e/v7x
    # when a looser tolerance is acceptable).
    params = prepare_params(wq, bq, wk, bk, wv, bv, max_seq_len=S,
                            compute_dtype=jnp.float32)

    out = self_attention_pallas(x, params)
    out = jax.block_until_ready(out)

    ref = jax.block_until_ready(self_attention_reference(x, wq, bq, wk, bk, wv, bv))
    np.testing.assert_allclose(np.asarray(out), np.asarray(ref),
                               rtol=1e-4, atol=1e-4)

    print("KERNEL_OK")
</pallas_src>

<mosaic_0001>
module attributes {stable_mosaic.version = 11 : i64} {
  func.func @_self_attention_kernel(%arg0: i32, %arg1: memref<2x16x32xf32, #tpu.memory_space<vmem>>, %arg2: memref<32x96xf32, #tpu.memory_space<vmem>>, %arg3: memref<1x96xf32, #tpu.memory_space<vmem>>, %arg4: memref<16x16xf32, #tpu.memory_space<vmem>>, %arg5: memref<16x16xf32, #tpu.memory_space<vmem>>, %arg6: memref<2x16x32xf32, #tpu.memory_space<vmem>>) attributes {dimension_semantics = [#tpu.dimension_semantics<parallel>], iteration_bounds = array<i64: 1>, scalar_prefetch = 0 : i64, scratch_operands = 0 : i64, tpu.core_type = #tpu.core_type<tc>, window_params = [{transform_indices = @transform_0, window_bounds = array<i64: 2, 16, 32>}, {pipeline_mode = #tpu.pipeline_mode<synchronous>, transform_indices = @transform_1, window_bounds = array<i64: 32, 96>}, {pipeline_mode = #tpu.pipeline_mode<synchronous>, transform_indices = @transform_2, window_bounds = array<i64: 1, 96>}, {pipeline_mode = #tpu.pipeline_mode<synchronous>, transform_indices = @transform_3, window_bounds = array<i64: 16, 16>}, {pipeline_mode = #tpu.pipeline_mode<synchronous>, transform_indices = @transform_4, window_bounds = array<i64: 16, 16>}, {transform_indices = @transform_5, window_bounds = array<i64: 2, 16, 32>}]} {
    %c0 = arith.constant 0 : index
    %c0_0 = arith.constant 0 : index
    %c0_1 = arith.constant 0 : index
    %0 = vector.load %arg1[%c0, %c0_0, %c0_1] : memref<2x16x32xf32, #tpu.memory_space<vmem>>, vector<2x16x32xf32>
    %1 = vector.shape_cast %0 : vector<2x16x32xf32> to vector<32x32xf32>
    %c0_2 = arith.constant 0 : index
    %c0_3 = arith.constant 0 : index
    %2 = vector.load %arg2[%c0_2, %c0_3] : memref<32x96xf32, #tpu.memory_space<vmem>>, vector<32x96xf32>
    %cst = arith.constant dense<0.000000e+00> : vector<32x96xf32>
    %3 = tpu.matmul %1, %2, %cst {dimension_numbers = #tpu.dot_dimension_numbers<[1], [0], [0], [1], [0, 0, 1, 1], [], []>} : vector<32x32xf32>, vector<32x96xf32>, vector<32x96xf32> -> vector<32x96xf32>
    %c0_4 = arith.constant 0 : index
    %c0_5 = arith.constant 0 : index
    %4 = vector.load %arg3[%c0_4, %c0_5] : memref<1x96xf32, #tpu.memory_space<vmem>>, vector<1x96xf32>
    %5 = vector.broadcast %4 : vector<1x96xf32> to vector<32x96xf32>
    %6 = arith.addf %3, %5 : vector<32x96xf32>
    %7 = vector.extract_strided_slice %6 {offsets = [0, 0], sizes = [32, 32], strides = [1, 1]} : vector<32x96xf32> to vector<32x32xf32>
    %8 = vector.shape_cast %7 : vector<32x32xf32> to vector<2x16x32xf32>
    %9 = vector.extract_strided_slice %6 {offsets = [0, 32], sizes = [32, 32], strides = [1, 1]} : vector<32x96xf32> to vector<32x32xf32>
    %10 = vector.shape_cast %9 : vector<32x32xf32> to vector<2x16x32xf32>
    %11 = vector.extract_strided_slice %6 {offsets = [0, 64], sizes = [32, 32], strides = [1, 1]} : vector<32x96xf32> to vector<32x32xf32>
    %12 = vector.shape_cast %11 : vector<32x32xf32> to vector<2x16x32xf32>
    %c0_6 = arith.constant 0 : index
    %c0_7 = arith.constant 0 : index
    %13 = vector.load %arg4[%c0_6, %c0_7] : memref<16x16xf32, #tpu.memory_space<vmem>>, vector<16x16xf32>
    %14 = vector.shape_cast %13 : vector<16x16xf32> to vector<1x16x16xf32>
    %c0_8 = arith.constant 0 : index
    %c0_9 = arith.constant 0 : index
    %15 = vector.load %arg5[%c0_8, %c0_9] : memref<16x16xf32, #tpu.memory_space<vmem>>, vector<16x16xf32>
    %16 = vector.shape_cast %15 : vector<16x16xf32> to vector<1x16x16xf32>
    %17 = vector.extract_strided_slice %8 {offsets = [0, 0, 0], sizes = [2, 16, 16], strides = [1, 1, 1]} : vector<2x16x32xf32> to vector<2x16x16xf32>
    %18 = vector.extract_strided_slice %8 {offsets = [0, 0, 16], sizes = [2, 16, 16], strides = [1, 1, 1]} : vector<2x16x32xf32> to vector<2x16x16xf32>
    %19 = vector.extract_strided_slice %10 {offsets = [0, 0, 0], sizes = [2, 16, 16], strides = [1, 1, 1]} : vector<2x16x32xf32> to vector<2x16x16xf32>
    %20 = vector.extract_strided_slice %10 {offsets = [0, 0, 16], sizes = [2, 16, 16], strides = [1, 1, 1]} : vector<2x16x32xf32> to vector<2x16x16xf32>
    %21 = vector.broadcast %14 : vector<1x16x16xf32> to vector<2x16x16xf32>
    %22 = arith.mulf %17, %21 : vector<2x16x16xf32>
    %23 = vector.broadcast %16 : vector<1x16x16xf32> to vector<2x16x16xf32>
    %24 = arith.mulf %18, %23 : vector<2x16x16xf32>
    %25 = arith.subf %22, %24 : vector<2x16x16xf32>
    %26 = vector.broadcast %16 : vector<1x16x16xf32> to vector<2x16x16xf32>
    %27 = arith.mulf %17, %26 : vector<2x16x16xf32>
    %28 = vector.broadcast %14 : vector<1x16x16xf32> to vector<2x16x16xf32>
    %29 = arith.mulf %18, %28 : vector<2x16x16xf32>
    %30 = arith.addf %27, %29 : vector<2x16x16xf32>
    %31 = tpu.concatenate %25, %30 in 2 : vector<2x16x16xf32>, vector<2x16x16xf32> -> vector<2x16x32xf32>
    %32 = vector.broadcast %14 : vector<1x16x16xf32> to vector<2x16x16xf32>
    %33 = arith.mulf %19, %32 : vector<2x16x16xf32>
    %34 = vector.broadcast %16 : vector<1x16x16xf32> to vector<2x16x16xf32>
    %35 = arith.mulf %20, %34 : vector<2x16x16xf32>
    %36 = arith.subf %33, %35 : vector<2x16x16xf32>
    %37 = vector.broadcast %16 : vector<1x16x16xf32> to vector<2x16x16xf32>
    %38 = arith.mulf %19, %37 : vector<2x16x16xf32>
    %39 = vector.broadcast %14 : vector<1x16x16xf32> to vector<2x16x16xf32>
    %40 = arith.mulf %20, %39 : vector<2x16x16xf32>
    %41 = arith.addf %38, %40 : vector<2x16x16xf32>
    %42 = tpu.concatenate %36, %41 in 2 : vector<2x16x16xf32>, vector<2x16x16xf32> -> vector<2x16x32xf32>
    "tpu.trace_start"() <{level = 10 : i32, message = "bqd,bkd->bqk"}> : () -> ()
    %cst_10 = arith.constant dense<0.000000e+00> : vector<2x16x16xf32>
    %43 = tpu.matmul %31, %42, %cst_10 {dimension_numbers = #tpu.dot_dimension_numbers<[2], [2], [1], [1], [0, 0, 0, 1, 1, 1], [0], [0]>} : vector<2x16x32xf32>, vector<2x16x32xf32>, vector<2x16x16xf32> -> vector<2x16x16xf32>
    "tpu.trace_stop"() : () -> ()
    %cst_11 = arith.constant dense<0xFF800000> : vector<2x16xf32>
    %44 = vector.multi_reduction <maximumf>, %43, %cst_11 [2] : vector<2x16x16xf32> to vector<2x16xf32>
    %45 = vector.shape_cast %44 : vector<2x16xf32> to vector<2x16x1xf32>
    %46 = vector.broadcast %45 : vector<2x16x1xf32> to vector<2x16x16xf32>
    %47 = arith.subf %43, %46 : vector<2x16x16xf32>
    %48 = math.exp %47 : vector<2x16x16xf32>
    %cst_12 = arith.constant dense<0.000000e+00> : vector<2x16xf32>
    %49 = vector.multi_reduction <add>, %48, %cst_12 [2] : vector<2x16x16xf32> to vector<2x16xf32>
    %50 = vector.shape_cast %49 : vector<2x16xf32> to vector<2x16x1xf32>
    %51 = tpu.reciprocal %50 : vector<2x16x1xf32> -> vector<2x16x1xf32>
    %52 = vector.broadcast %51 : vector<2x16x1xf32> to vector<2x16x16xf32>
    %53 = arith.mulf %48, %52 : vector<2x16x16xf32>
    "tpu.trace_start"() <{level = 10 : i32, message = "bqk,bkd->bqd"}> : () -> ()
    %cst_13 = arith.constant dense<0.000000e+00> : vector<2x16x32xf32>
    %54 = tpu.matmul %53, %12, %cst_13 {dimension_numbers = #tpu.dot_dimension_numbers<[2], [1], [1], [2], [0, 0, 0, 1, 1, 2], [0], [0]>} : vector<2x16x16xf32>, vector<2x16x32xf32>, vector<2x16x32xf32> -> vector<2x16x32xf32>
    "tpu.trace_stop"() : () -> ()
    %c0_14 = arith.constant 0 : index
    %c0_15 = arith.constant 0 : index
    %c0_16 = arith.constant 0 : index
    %55 = vector.load %arg6[%c0_14, %c0_15, %c0_16] : memref<2x16x32xf32, #tpu.memory_space<vmem>>, vector<2x16x32xf32>
    tpu.vector_store %arg6[%c0_14, %c0_15, %c0_16], %54 {strides = array<i32>} : memref<2x16x32xf32, #tpu.memory_space<vmem>>, vector<2x16x32xf32>,
    return
  }
  func.func @transform_0(%arg0: i32) -> (i32, i32, i32) {
    %c0_i32 = arith.constant 0 : i32
    %c0_i32_0 = arith.constant 0 : i32
    %c0_i32_1 = arith.constant 0 : i32
    return %arg0, %c0_i32, %c0_i32_0 : i32, i32, i32
  }
  func.func @transform_1(%arg0: i32) -> (i32, i32) {
    %c0_i32 = arith.constant 0 : i32
    %c0_i32_0 = arith.constant 0 : i32
    %c0_i32_1 = arith.constant 0 : i32
    return %c0_i32, %c0_i32_0 : i32, i32
  }
  func.func @transform_2(%arg0: i32) -> (i32, i32) {
    %c0_i32 = arith.constant 0 : i32
    %c0_i32_0 = arith.constant 0 : i32
    %c0_i32_1 = arith.constant 0 : i32
    return %c0_i32, %c0_i32_0 : i32, i32
  }
  func.func @transform_3(%arg0: i32) -> (i32, i32) {
    %c0_i32 = arith.constant 0 : i32
    %c0_i32_0 = arith.constant 0 : i32
    %c0_i32_1 = arith.constant 0 : i32
    return %c0_i32, %c0_i32_0 : i32, i32
  }
  func.func @transform_4(%arg0: i32) -> (i32, i32) {
    %c0_i32 = arith.constant 0 : i32
    %c0_i32_0 = arith.constant 0 : i32
    %c0_i32_1 = arith.constant 0 : i32
    return %c0_i32, %c0_i32_0 : i32, i32
  }
  func.func @transform_5(%arg0: i32) -> (i32, i32, i32) {
    %c0_i32 = arith.constant 0 : i32
    %c0_i32_0 = arith.constant 0 : i32
    %c0_i32_1 = arith.constant 0 : i32
    return %arg0, %c0_i32, %c0_i32_0 : i32, i32, i32
  }
}

</mosaic_0001>

<bundles_post_ra>
// kernel: tpu_custom_call.1
= control target key start
LH: loop header
LB: loop body
LE: loop exit
PB: predicated region body
PF: predicated region fallthrough
CT: control target
= control target key end

     0   :  { %10 = vsyncpa [#allocation3], 0  ;;  %s1265_s0 = inlined_call_operand.hbm [shape: f32[2,16,32], index: 0, kind: input, shape index: {}]   ;;  %s1266_s1 = inlined_call_operand.hbm [shape: f32[32,96], index: 1, kind: input, shape index: {}]   ;;  %s1267_s2 = inlined_call_operand.vmem [shape: f32[1,96], index: 2, kind: input, shape index: {}]   ;;  %s1268_s3 = inlined_call_operand.hbm [shape: f32[16,16], index: 3, kind: input, shape index: {}]   ;;  %s1269_s4 = inlined_call_operand.hbm [shape: f32[16,16], index: 4, kind: input, shape index: {}]   ;;  %s1270_s5 = inlined_call_operand.hbm [shape: f32[2,16,32], index: 5, kind: output, shape index: {}]  }
   0x1   :  { %11 = vsyncpa [#allocation6], 0 }
   0x2   :  { %12 = vsyncpa [#allocation9], 0 }
   0x3   :  { %13 = vsyncpa [#allocation4], 0  ;;  %s1041_s18 = smov [#allocation5]   ;;  %s1042_s20 = smov [#allocation2]  }
   0x4   :  { %s31_s19 = sshll.u32 %s1041_s18, 4  ;;  %s19_s21 = sshll.u32 %s1042_s20, 4  ;;  %s32_s19 = int_to_ptr.vmem [resolvable:$true] %s31_s19  ;;  %s20_s21 = int_to_ptr.vmem [resolvable:$true] %s19_s21 }
   0x5   :  { %s941_s22 = scalar_lea.vmem %s32_s19, 512  ;;  %p946_p1 = scmp.lt.s32.totalorder %s32_s19, %s32_s19 }
   0x6   :  { %p942_p0 = scmp.ne.s32.totalorder %s32_s19, %s941_s22  ;;  %p947_p2 = scmp.lt.s32.totalorder %s941_s22, %s941_s22 }
   0x8   :  { %p948_p3 = por %p947_p2, %p946_p1 }
   0xa   :  { %p949_p4 = pnand %p948_p3, %p942_p0 }
   0xc   :  { %952 = shalt.err (!%p949_p4)
}
   0xd   :  { %s1043_s23 = smov 128   ;;  %s1044_s24 = smov 8  }
   0xe   :  { %37 = dma.hbm_to_vmem [thread:$0]  %s1266_s1, 512, %s32_s19, [#allocation6], %s1043_s23, %s1043_s23, %s1044_s24  }
   0xf   :  { %s961_s27 = scalar_lea.vmem %s20_s21, 512  ;;  %p966_p6 = scmp.lt.s32.totalorder %s20_s21, %s20_s21 }
  0x10   :  { %p962_p5 = scmp.ne.s32.totalorder %s20_s21, %s961_s27  ;;  %p967_p7 = scmp.lt.s32.totalorder %s961_s27, %s961_s27 }
  0x12   :  { %p968_p8 = por %p967_p7, %p966_p6 }
  0x14   :  { %p969_p9 = pnand %p968_p8, %p962_p5 }
  0x16   :  { %972 = shalt.err (!%p969_p9)
}
  0x17   :  { %25 = dma.hbm_to_vmem [thread:$0]  %s1265_s0, 512, %s20_s21, [#allocation3], %s1043_s23, %s1043_s23, %s1044_s24  }
  0x18   :  { %s1045_s30 = smov [#allocation7]   ;;  %s1046_s7 = smov [#allocation8]  }
  0x19   :  { %s45_s6 = sshll.u32 %s1045_s30, 4  ;;  %s57_s8 = sshll.u32 %s1046_s7, 4  ;;  %s46_s6 = int_to_ptr.vmem [resolvable:$true] %s45_s6  ;;  %s58_s8 = int_to_ptr.vmem [resolvable:$true] %s57_s8 }
  0x1a   :  { %s981_s1 = scalar_lea.vmem %s46_s6, 256  ;;  %p986_p11 = scmp.lt.s32.totalorder %s46_s6, %s46_s6 }
  0x1b   :  { %p982_p10 = scmp.ne.s32.totalorder %s46_s6, %s981_s1  ;;  %p987_p12 = scmp.lt.s32.totalorder %s981_s1, %s981_s1 }
  0x1d   :  { %p988_p13 = por %p987_p12, %p986_p11 }
  0x1f   :  { %p989_p0 = pnand %p988_p13, %p982_p10 }
  0x21   :  { %992 = shalt.err (!%p989_p0)
}
  0x22   :  { %51 = dma.hbm_to_vmem [thread:$0]  %s1268_s3, 256, %s46_s6, [#allocation6], %s1043_s23, %s1043_s23, %s1044_s24  }
  0x23   :  { %s1001_s0 = scalar_lea.vmem %s58_s8, 256  ;;  %p1006_p2 = scmp.lt.s32.totalorder %s58_s8, %s58_s8 }
  0x24   :  { %p1002_p1 = scmp.ne.s32.totalorder %s58_s8, %s1001_s0  ;;  %p1007_p3 = scmp.lt.s32.totalorder %s1001_s0, %s1001_s0 }
  0x26   :  { %p1008_p4 = por %p1007_p3, %p1006_p2 }
  0x28   :  { %p1009_p5 = pnand %p1008_p4, %p1002_p1 }
  0x2a   :  { %1012 = shalt.err (!%p1009_p5)
}
  0x2b   :  { %63 = dma.hbm_to_vmem [thread:$0]  %s1269_s4, 256, %s58_s8, [#allocation9], %s1043_s23, %s1043_s23, %s1044_s24  }
  0x2c   :  { %1033 = dma.done.wait [#allocation3], 512  }
  0x2d   :  { %1034 = vsyncadd [#allocation3], 4294966784 }
  0x2e   :  { %1035 = dma.done.wait [#allocation6], 768  }
  0x2f   :  { %1036 = vsyncadd [#allocation6], 4294966528 }
  0x30   :  { %1037 = dma.done.wait [#allocation9], 256  }
  0x31   :  { %1038 = vsyncadd [#allocation9], 4294967040  ;;  %vm91_vm0 = vcmask 261120   ;;  %v83_v0 = vld [vmem:[#allocation5 + $0x18] sm:$0xff]  ;;  %v82_v1 = vld [vmem:[#allocation5 + $0x10] sm:$0xff]  ;;  %s1047_s3 = smov 48  }
  0x32   :  { %862 = vmatprep.subr.mxu0 %v83_v0  ;;  %v76_v2 = vld [vmem:[#allocation2] sm:$0xff]  ;;  %v81_v3 = vld [vmem:[#allocation5 + $0x8] sm:$0xff]  ;;  %v1109_v4 = vld [vmem:[#allocation8] sm:$0xff]  ;;  %s1048_s4 = smov 16   ;;  %s1049_s13 = smov 32   ;;  %vm281_vm1 = vcmask 130048  }
  0x33   :  { %863 = vmatpush3.msra.mxu0 %v83_v0  ;;  %870 = vmatprep.mubr.msk.f32.mxu0 %vm91_vm0, %v76_v2  ;;  %v1112_v5 = vld [vmem:[#allocation8 + $0x8] sm:$0xff]  ;;  %v80_v6 = vld [vmem:[#allocation5] sm:$0xff]  ;;  %v1117_v8 = vld [vmem:[#allocation7 + $0x8] sm:$0xff]  ;;  %s1050_s16 = smov 112   ;;  %s1052_s17 = smov 64  }
  0x34   :  { %864 = vmatprep.subr.mxu0 %v82_v1  ;;  %296 = vrot.lane.b32.xlu1 %v1109_v4, %s1047_s3  ;;  %v1115_v7 = vld [vmem:[#allocation7] sm:$0xff]  ;;  %v77_v9 = vld [vmem:[#allocation2 + $0x8] sm:$0xff]  ;;  %v78_v10 = vld [vmem:[#allocation2 + $0x10] sm:$0xff]  ;;  %s1053_s18 = smov [#allocation10]  }
  0x35   :  { %865 = vmatpush3.msra.mxu0 %v82_v1  ;;  %298 = vrot.lane.b32.xlu0 %v1112_v5, %s1047_s3  ;;  %v79_v11 = vld [vmem:[#allocation2 + $0x18] sm:$0xff]  ;;  %v821_v14 = vld [vmem:[%s1267_s2] ss:$0 sm:$0xff]  ;;  %s1051_s2 = smov 96   ;;  %s807_s19 = sshll.u32 %s1053_s18, 4  ;;  %s808_s19 = int_to_ptr.vmem [resolvable:$true] %s807_s19 }
  0x36   :  { %866 = vmatprep.subr.mxu0 %v81_v3  ;;  %s1013_s20 = scalar_lea.vmem %s808_s19, 512  ;;  %p1018_p7 = scmp.lt.s32.totalorder %s808_s19, %s808_s19 }
  0x37   :  { %867 = vmatpush3.msra.mxu0 %v81_v3  ;;  %p1014_p6 = scmp.ne.s32.totalorder %s808_s19, %s1013_s20  ;;  %p1019_p8 = scmp.lt.s32.totalorder %s1013_s20, %s1013_s20 }
  0x38   :  { %868 = vmatprep.subr.mxu0 %v80_v6  ;;  %336 = vrot.lane.b32.xlu1 %v1115_v7, %s1047_s3 }
  0x39   :  { %869 = vmatpush3.msra.mxu0 %v80_v6  ;;  %338 = vrot.lane.b32.xlu0 %v1117_v8, %s1047_s3  ;;  %p1020_p9 = por %p1019_p8, %p1018_p7 }
  0x3a   :  { %871 = vmatmul.mubr.msk.f32.vlgmr.msra.gmra.mxu0 %vm91_vm0, %v77_v9 }
  0x3b   :  { %873 = vmatprep.mubr.msk.f32.mxu0 %vm91_vm0, %v78_v10  ;;  %p1021_p10 = pnand %p1020_p9, %p1014_p6 }
  0x3c   :  { %237 = vrot.lane.b32.xlu1 %v1117_v8, %s1048_s4 }
  0x3d   :  { %235 = vrot.lane.b32.xlu0 %v1115_v7, %s1048_s4 }
  0x3e   :  { %874 = vmatmul.mubr.msk.f32.gmra.mxu0 %vm91_vm0, %v79_v11 }
  0x40   :  { %328 = vrot.lane.b32.xlu1 %v1112_v5, %s1049_s13 }
  0x41   :  { %288 = vrot.lane.b32.xlu0 %v1117_v8, %s1049_s13 }
  0x44   :  { %326 = vrot.lane.b32.xlu1 %v1109_v4, %s1049_s13 }
  0x45   :  { %286 = vrot.lane.b32.xlu0 %v1115_v7, %s1049_s13 }
  0x48   :  { %201 = vrot.lane.b32.xlu1 %v1112_v5, %s1048_s4 }
  0x49   :  { %199 = vrot.lane.b32.xlu0 %v1109_v4, %s1048_s4 }
  0xa6   :  { %v297_v12 = vpop.permute.xlu1 %296 }
  0xa7   :  { %v299_v13 = vpop.permute.xlu0 %298 }
  0xaa   :  { %v337_v15 = vpop.permute.xlu1 %336 }
  0xab   :  { %v339_v16 = vpop.permute.xlu0 %338 }
  0xae   :  { %v238_v24 = vpop.permute.xlu1 %237 }
  0xaf   :  { %v236_v25 = vpop.permute.xlu0 %235 }
  0xb2   :  { %v329_v29 = vpop.permute.xlu1 %328 }
  0xb3   :  { %v289_v32 = vpop.permute.xlu0 %288 }
  0xb6   :  { %v327_v37 = vpop.permute.xlu1 %326 }
  0xb7   :  { %v287_v38 = vpop.permute.xlu0 %286 }
  0xba   :  { %v202_v43 = vpop.permute.xlu1 %201 }
  0xbb   :  { %v200_v44 = vpop.permute.xlu0 %199 }
  0xfa   :  { %v872_v17 = vpop.f32.mrf.mxu0 }
  0xfb   :  { %v1139_v18 = vadd.f32 %v872_v17, %v821_v14 }
  0xfc   :  { %v170_v19 = vpop.f32.mrf.mxu0 }
  0xfd   :  { %v1141_v20 = vadd.f32 %v821_v14, %v170_v19  ;;  %v343_v21 = vmul.f32 %v339_v16, %v1139_v18  ;;  %v303_v22 = vmul.f32 %v299_v13, %v1139_v18  ;;  %v242_v27 = vmul.f32 %v238_v24, %v1139_v18 }
  0xfe   :  { %v875_v23 = vpop.f32.mrf.mxu0  ;;  %v206_v45 = vmul.f32 %v202_v43, %v1139_v18  ;;  %v333_v49 = vmul.f32 %v329_v29, %v1139_v18  ;;  %v293_v50 = vmul.f32 %v289_v32, %v1139_v18  ;;  %v230_v55 = vmul.f32 %v1112_v5, %v1139_v18 }
  0xff   :  { %352 = vrot.lane.b32.xlu1 %v343_v21, %s1050_s16  ;;  %312 = vrot.lane.b32.xlu0 %v303_v22, %s1050_s16  ;;  %v1147_v26 = vadd.f32 %v875_v23, %v821_v14  ;;  %v302_v28 = vmul.f32 %v297_v12, %v1141_v20  ;;  %v342_v31 = vmul.f32 %v337_v15, %v1141_v20 }
 0x100   :  { %v180_v33 = vpop.f32.mrf.mxu0  ;;  %v241_v36 = vmul.f32 %v236_v25, %v1141_v20  ;;  %v205_v46 = vmul.f32 %v200_v44, %v1141_v20  ;;  %v292_v56 = vmul.f32 %v287_v38, %v1141_v20  ;;  %v332_v62 = vmul.f32 %v327_v37, %v1141_v20 }
 0x101   :  { %v305_v30 = vmul.f32 %v299_v13, %v1147_v26  ;;  %v1157_v34 = vadd.f32 %v821_v14, %v180_v33  ;;  %v345_v35 = vmul.f32 %v339_v16, %v1147_v26  ;;  %v244_v41 = vmul.f32 %v238_v24, %v1147_v26 }
 0x102   :  { %v208_v47 = vmul.f32 %v202_v43, %v1147_v26  ;;  %v295_v61 = vmul.f32 %v289_v32, %v1147_v26  ;;  %v335_v3 = vmul.f32 %v329_v29, %v1147_v26  ;;  %v229_v6 = vmul.f32 %v1109_v4, %v1141_v20 }
 0x103   :  { %251 = vrot.lane.b32.xlu1 %v242_v27, %s1050_s16  ;;  %310 = vrot.lane.b32.xlu0 %v302_v28, %s1050_s16  ;;  %v344_v39 = vmul.f32 %v337_v15, %v1157_v34  ;;  %v304_v40 = vmul.f32 %v297_v12, %v1157_v34  ;;  %v243_v42 = vmul.f32 %v236_v25, %v1157_v34 }
 0x104   :  { %v207_v48 = vmul.f32 %v200_v44, %v1157_v34  ;;  %v334_v13 = vmul.f32 %v327_v37, %v1157_v34  ;;  %v294_v14 = vmul.f32 %v287_v38, %v1157_v34  ;;  %v232_v21 = vmul.f32 %v1112_v5, %v1147_v26 }
 0x105   :  { %v231_v22 = vmul.f32 %v1109_v4, %v1157_v34  ;;  %v193_v38 = vmul.f32 %v1115_v7, %v1141_v20 }
 0x107   :  { %316 = vrot.lane.b32.xlu1 %v305_v30, %s1050_s16  ;;  %350 = vrot.lane.b32.xlu0 %v342_v31, %s1050_s16 }
 0x10b   :  { %356 = vrot.lane.b32.xlu1 %v345_v35, %s1050_s16  ;;  %249 = vrot.lane.b32.xlu0 %v241_v36, %s1050_s16 }
 0x10f   :  { %354 = vrot.lane.b32.xlu1 %v344_v39, %s1050_s16  ;;  %314 = vrot.lane.b32.xlu0 %v304_v40, %s1050_s16  ;;  %v194_v40 = vmul.f32 %v1117_v8, %v1139_v18 }
 0x113   :  { %255 = vrot.lane.b32.xlu1 %v244_v41, %s1050_s16  ;;  %253 = vrot.lane.b32.xlu0 %v243_v42, %s1050_s16 }
 0x117   :  { %215 = vrot.lane.b32.xlu1 %v206_v45, %s1050_s16  ;;  %213 = vrot.lane.b32.xlu0 %v205_v46, %s1050_s16 }
 0x11b   :  { %219 = vrot.lane.b32.xlu1 %v208_v47, %s1050_s16  ;;  %217 = vrot.lane.b32.xlu0 %v207_v48, %s1050_s16 }
 0x171   :  { %v353_v51 = vpop.permute.xlu1 %352  ;;  %v313_v52 = vpop.permute.xlu0 %312 }
 0x172   :  { %v363_v53 = vadd.f32 %v353_v51, %v333_v49  ;;  %v323_v54 = vsub.f32 %v293_v50, %v313_v52  ;;  %v196_v50 = vmul.f32 %v1117_v8, %v1147_v26  ;;  %v195_v51 = vmul.f32 %v1115_v7, %v1157_v34 }
 0x174   :  { %388 = vrot.lane.b32.xlu1 %v363_v53, %s1050_s16  ;;  %372 = vrot.lane.b32.xlu0 %v323_v54, %s1051_s2 }
 0x175   :  { %v252_v57 = vpop.permute.xlu1 %251  ;;  %v311_v58 = vpop.permute.xlu0 %310 }
 0x176   :  { %v262_v59 = vadd.f32 %v252_v57, %v230_v55  ;;  %v322_v60 = vsub.f32 %v292_v56, %v311_v58 }
 0x178   :  { %271 = vrot.lane.b32.xlu1 %v262_v59, %s1048_s4  ;;  %370 = vrot.lane.b32.xlu0 %v322_v60, %s1051_s2 }
 0x179   :  { %v317_v63 = vpop.permute.xlu1 %316  ;;  %v351_v0 = vpop.permute.xlu0 %350 }
 0x17a   :  { %v325_v1 = vsub.f32 %v295_v61, %v317_v63  ;;  %v362_v2 = vadd.f32 %v351_v0, %v332_v62 }
 0x17c   :  { %376 = vrot.lane.b32.xlu1 %v325_v1, %s1051_s2  ;;  %386 = vrot.lane.b32.xlu0 %v362_v2, %s1050_s16 }
 0x17d   :  { %v357_v9 = vpop.permute.xlu1 %356  ;;  %v250_v10 = vpop.permute.xlu0 %249 }
 0x17e   :  { %v365_v11 = vadd.f32 %v357_v9, %v335_v3  ;;  %v261_v12 = vadd.f32 %v250_v10, %v229_v6 }
 0x180   :  { %392 = vrot.lane.b32.xlu1 %v365_v11, %s1050_s16  ;;  %269 = vrot.lane.b32.xlu0 %v261_v12, %s1048_s4 }
 0x181   :  { %v355_v15 = vpop.permute.xlu1 %354  ;;  %v315_v16 = vpop.permute.xlu0 %314 }
 0x182   :  { %v364_v17 = vadd.f32 %v355_v15, %v334_v13  ;;  %v324_v19 = vsub.f32 %v294_v14, %v315_v16 }
 0x184   :  { %390 = vrot.lane.b32.xlu1 %v364_v17, %s1050_s16  ;;  %374 = vrot.lane.b32.xlu0 %v324_v19, %s1051_s2 }
 0x185   :  { %v256_v23 = vpop.permute.xlu1 %255  ;;  %v254_v24 = vpop.permute.xlu0 %253 }
 0x186   :  { %v264_v25 = vadd.f32 %v256_v23, %v232_v21  ;;  %v263_v27 = vadd.f32 %v254_v24, %v231_v22 }
 0x188   :  { %275 = vrot.lane.b32.xlu1 %v264_v25, %s1048_s4  ;;  %273 = vrot.lane.b32.xlu0 %v263_v27, %s1048_s4 }
 0x189   :  { %v216_v28 = vpop.permute.xlu1 %215  ;;  %v214_v29 = vpop.permute.xlu0 %213 }
 0x18a   :  { %v225_v41 = vsub.f32 %v193_v38, %v214_v29  ;;  %v226_v42 = vsub.f32 %v194_v40, %v216_v28 }
 0x18d   :  { %v220_v30 = vpop.permute.xlu1 %219  ;;  %v218_v31 = vpop.permute.xlu0 %217 }
 0x18e   :  { %v228_v53 = vsub.f32 %v196_v50, %v220_v30  ;;  %v227_v54 = vsub.f32 %v195_v51, %v218_v31 }
 0x1e6   :  { %v389_v32 = vpop.permute.xlu1 %388  ;;  %v373_v33 = vpop.permute.xlu0 %372 }
 0x1e7   :  { %v399_v5 = vsel %vm281_vm1, %v373_v33, %v389_v32 }
 0x1e8   :  { %876 = vmatprep.subr.msk.mxu1 %vm91_vm0, %v399_v5 }
 0x1e9   :  { %877 = vmatpush3.xpose.msk.msra.mxu1 %vm91_vm0, %v399_v5 }
 0x1ea   :  { %v272_v4 = vpop.permute.xlu1 %271  ;;  %v371_v35 = vpop.permute.xlu0 %370 }
 0x1eb   :  { %v283_v47 = vsel %vm281_vm1, %v226_v42, %v272_v4 }
 0x1ee   :  { %v377_v36 = vpop.permute.xlu1 %376  ;;  %v387_v37 = vpop.permute.xlu0 %386 }
 0x1ef   :  { %v398_v39 = vsel %vm281_vm1, %v371_v35, %v387_v37 }
 0x1f0   :  { %878 = vmatprep.subr.msk.mxu1 %vm91_vm0, %v398_v39 }
 0x1f1   :  { %879 = vmatpush3.xpose.msk.msra.mxu1 %vm91_vm0, %v398_v39 }
 0x1f2   :  { %v393_v43 = vpop.permute.xlu1 %392  ;;  %v270_v44 = vpop.permute.xlu0 %269 }
 0x1f3   :  { %v401_v45 = vsel %vm281_vm1, %v377_v36, %v393_v43  ;;  %v282_v46 = vsel %vm281_vm1, %v225_v41, %v270_v44 }
 0x1f4   :  { %880 = vmatprep.mubr.msk.f32.mxu1 %vm91_vm0, %v282_v46  ;;  %883 = vmatprep.subr.msk.mxu0 %vm91_vm0, %v401_v45 }
 0x1f5   :  { %881 = vmatmul.mubr.msk.f32.vlgmr.msra.gmra.mxu1 %vm91_vm0, %v283_v47  ;;  %884 = vmatpush3.xpose.msk.msra.mxu0 %vm91_vm0, %v401_v45 }
 0x1f6   :  { %v391_v48 = vpop.permute.xlu1 %390  ;;  %v375_v49 = vpop.permute.xlu0 %374 }
 0x1f7   :  { %v400_v52 = vsel %vm281_vm1, %v375_v49, %v391_v48 }
 0x1f8   :  { %885 = vmatprep.subr.msk.mxu0 %vm91_vm0, %v400_v52 }
 0x1f9   :  { %886 = vmatpush3.xpose.msk.msra.mxu0 %vm91_vm0, %v400_v52 }
 0x1fa   :  { %v276_v55 = vpop.permute.xlu1 %275  ;;  %v274_v56 = vpop.permute.xlu0 %273 }
 0x1fb   :  { %v285_v57 = vsel %vm281_vm1, %v228_v53, %v276_v55  ;;  %v284_v58 = vsel %vm281_vm1, %v227_v54, %v274_v56 }
 0x1fc   :  { %887 = vmatprep.mubr.msk.f32.mxu0 %vm91_vm0, %v284_v58 }
 0x1fd   :  { %888 = vmatmul.mubr.msk.f32.vlgmr.msra.gmra.mxu0 %vm91_vm0, %v285_v57 }
 0x2b5   :  { %v882_v8 = vpop.f32.mrf.mxu1 }
 0x2b6   :  { %v579_v7 = vsel %vm281_vm1, %v882_v8, -inf }
 0x2b7   :  { %580 = vmax.xlane.f32.xlu1 %v579_v7  ;;  %v480_v59 = vpop.f32.mrf.mxu1 }
 0x2b8   :  { %v576_v60 = vsel %vm281_vm1, %v480_v59, -inf }
 0x2b9   :  { %577 = vmax.xlane.f32.xlu0 %v576_v60 }
 0x2bd   :  { %v889_v61 = vpop.f32.mrf.mxu0 }
 0x2be   :  { %v585_v0 = vsel %vm281_vm1, %v889_v61, -inf }
 0x2bf   :  { %v567_v62 = vpop.f32.mrf.mxu0 }
 0x2c0   :  { %v582_v63 = vsel %vm281_vm1, %v567_v62, -inf }
 0x2c1   :  { %583 = vmax.xlane.f32.xlu0 %v582_v63 }
 0x2c5   :  { %586 = vmax.xlane.f32.xlu0 %v585_v0 }
 0x2c8   :  { %624 = vrot.lane.b32.xlu1 %v1139_v18, %s1052_s17 }
 0x340   :  { %v581_v1 = vpop.xlane.xlu1 %580 }
 0x341   :  { %v589_v2 = vsub.f32 %v882_v8, %v581_v1 }
 0x342   :  { %v578_v3 = vpop.xlane.xlu0 %577 }
 0x343   :  { %v594_v6 = vmul.f32 1.442695, %v589_v2  ;;  %v588_v9 = vsub.f32 %v480_v59, %v578_v3 }
 0x344   :  { %v625_v10 = vpop.permute.xlu1 %624 }
 0x345   :  { %917 = vpow2.f32 %v594_v6  ;;  %v592_v11 = vmul.f32 1.442695, %v588_v9  ;;  %890 = vmatprep.subr.mxu1 %v625_v10 }
 0x346   :  { %891 = vmatpush3.msra.mxu1 %v625_v10 }
 0x347   :  { %919 = vpow2.f32 %v592_v11 }
 0x34a   :  { %v584_v12 = vpop.xlane.xlu0 %583 }
 0x34b   :  { %v590_v23 = vsub.f32 %v567_v62, %v584_v12 }
 0x34d   :  { %v596_v24 = vmul.f32 1.442695, %v590_v23 }
 0x34e   :  { %v587_v13 = vpop.xlane.xlu0 %586 }
 0x34f   :  { %v591_v14 = vsub.f32 %v889_v61, %v587_v13 }
 0x351   :  { %v598_v15 = vmul.f32 1.442695, %v591_v14 }
 0x352   :  { %v918_v16 = vpop.eup %917 }
 0x353   :  { %921 = vpow2.f32 %v598_v15  ;;  %v603_v17 = vsel %vm281_vm1, %v918_v16, 0.0 }
 0x354   :  { %v920_v18 = vpop.eup %919  ;;  %604 = vadd.xlane.f32.xlu0 %v603_v17  ;;  %923 = vpow2.f32 %v596_v24 }
 0x355   :  { %v600_v19 = vsel %vm281_vm1, %v920_v18, 0.0 }
 0x356   :  { %601 = vadd.xlane.f32.xlu1 %v600_v19 }
 0x360   :  { %v922_v21 = vpop.eup %921 }
 0x361   :  { %v609_v22 = vsel %vm281_vm1, %v922_v21, 0.0  ;;  %v924_v25 = vpop.eup %923 }
 0x362   :  { %610 = vadd.xlane.f32.xlu0 %v609_v22  ;;  %v606_v27 = vsel %vm281_vm1, %v924_v25, 0.0 }
 0x367   :  { %713 = vrot.lane.b32.xlu1 %v1147_v26, %s1052_s17 }
 0x378   :  { %622 = vrot.lane.b32.xlu0 %v1141_v20, %s1052_s17 }
 0x38b   :  { %607 = vadd.xlane.f32.xlu1 %v606_v27 }
 0x39c   :  { %711 = vrot.lane.b32.xlu1 %v1157_v34, %s1052_s17 }
 0x3dd   :  { %v605_v28 = vpop.xlane.xlu0 %604 }
 0x3de   :  { %925 = vrcp.f32 %v605_v28 }
 0x3df   :  { %v602_v29 = vpop.xlane.xlu1 %601 }
 0x3e0   :  { %927 = vrcp.f32 %v602_v29 }
 0x3e3   :  { %v714_v5 = vpop.permute.xlu1 %713 }
 0x3eb   :  { %v611_v30 = vpop.xlane.xlu0 %610  ;;  %v926_v31 = vpop.eup %925 }
 0x3ec   :  { %v617_v20 = vmul.f32 %v926_v31, %v918_v16  ;;  %929 = vrcp.f32 %v611_v30 }
 0x3ed   :  { %v928_v26 = vpop.eup %927 }
 0x3ee   :  { %v616_v32 = vmul.f32 %v928_v26, %v920_v18 }
 0x3ef   :  { %v623_v33 = vpop.permute.xlu0 %622 }
 0x3f0   :  { %892 = vmatprep.subr.mxu1 %v623_v33  ;;  %894 = vmatprep.mubr.msk.f32.mxu1 %vm281_vm1, %v616_v32 }
 0x3f1   :  { %893 = vmatpush3.msra.mxu1 %v623_v33 }
 0x3f2   :  { %895 = vmatmul.mubr.msk.f32.vlgmr.msra.gmra.mxu1 %vm281_vm1, %v617_v20  ;;  %897 = vmatprep.subr.mxu1 %v714_v5 }
 0x3f3   :  { %898 = vmatpush3.msra.mxu1 %v714_v5 }
 0x3f9   :  { %v930_v35 = vpop.eup %929 }
 0x3fa   :  { %v619_v38 = vmul.f32 %v930_v35, %v922_v21 }
 0x414   :  { %v608_v34 = vpop.xlane.xlu1 %607 }
 0x415   :  { %931 = vrcp.f32 %v608_v34 }
 0x418   :  { %v712_v4 = vpop.permute.xlu1 %711 }
 0x419   :  { %899 = vmatprep.subr.mxu1 %v712_v4 }
 0x41a   :  { %900 = vmatpush3.msra.mxu1 %v712_v4 }
 0x422   :  { %v932_v36 = vpop.eup %931 }
 0x423   :  { %v618_v37 = vmul.f32 %v932_v36, %v924_v25 }
 0x425   :  { %901 = vmatprep.mubr.msk.f32.mxu1 %vm281_vm1, %v618_v37 }
 0x426   :  { %902 = vmatmul.mubr.msk.f32.vlgmr.msra.gmra.mxu1 %vm281_vm1, %v619_v38 }
 0x4b2   :  { %v896_v39 = vpop.f32.mrf.mxu1 }
 0x4b3   :  { %799 = vst.msk [vmem:[#allocation10 + $0x8] sm:$0xff] %vm91_vm0, %v896_v39 }
 0x4b4   :  { %v700_v40 = vpop.f32.mrf.mxu1 }
 0x4b5   :  { %798 = vst.msk [vmem:[#allocation10] sm:$0xff] %vm91_vm0, %v700_v40 }
 0x4e6   :  { %v903_v41 = vpop.f32.mrf.mxu1 }
 0x4e7   :  { %801 = vst.msk [vmem:[#allocation10 + $0x18] sm:$0xff] %vm91_vm0, %v903_v41 }
 0x4e8   :  { %v789_v42 = vpop.f32.mrf.mxu1 }
 0x4e9   :  { %800 = vst.msk [vmem:[#allocation10 + $0x10] sm:$0xff] %vm91_vm0, %v789_v42 }
 0x4ea   :  { %1024 = shalt.err (!%p1021_p10)
}
 0x4eb   :  { %813 = dma.vmem_to_hbm [thread:$0]  %s808_s19, 512, %s1270_s5, [#allocation4], %s1043_s23, %s1043_s23, %s1044_s24  }
 0x4ec   :  { %1039 = dma.done.wait [#allocation4], 512  }
 0x4ed   :  { %1040 = vsyncadd [#allocation4], 4294966784 }
 0x4ee   :  { %817 = vsyncpa [#allocation3], 1 }
 0x4ef   :  { %818 = vsyncpa [#allocation6], 1 }
 0x4f0   :  { %819 = vsyncpa [#allocation9], 1 }
 0x4f1   :  { %820 = vsyncpa [#allocation4], 1 }

</bundles_post_ra>
